<compile_context>
chip_gen: v6e
topology: v6e:2x2x1
jax: 0.10.0
libtpu: 0.0.40
codegen_flags: <defaults>
</compile_context>

<pallas_src>
import jax
import jax.numpy as jnp
from jax import lax
from jax.experimental import pallas as pl
from jax.experimental.pallas import tpu as pltpu

EPS = 1e-5                       # BatchNorm1d default eps
HALO = 16                        # halo frames per tile (need 2; 16 = bf16 sublane tile)
DEFAULT_TILE_FRAMES = 4096       # output frames per kernel-A grid step
DEFAULT_BN_TILE_ROWS = 8192      # rows per kernel-B grid step
VMEM_LIMIT = 32 * 1024 * 1024    # scoped-VMEM cap, safe on v5e/v6e/v7x


def _round_up(a, b):
    return (a + b - 1) // b * b


def tdnn_layer2(x, w, b, gamma, beta, *,
                tile_frames=DEFAULT_TILE_FRAMES,
                bn_tile_rows=DEFAULT_BN_TILE_ROWS):
    """x: (B, T, 64); w: (16, 64) torch-style; b: (16,); gamma/beta: (64,)."""
    B, T, F = x.shape
    assert F == 64, "Linear is hard-coded to 64 -> 16 in the PyTorch module"
    Tout = T - 2                              # context [-1, 0, 1]
    assert Tout > 0
    R = B * Tout                              # total output frames
    dt = x.dtype
    cdt = jnp.bfloat16                        # MXU staging / y_pre dtype

    # ---- tile sizing -------------------------------------------------------
    TF = _round_up(max(16, min(tile_frames, _round_up(Tout, 16))), 16)
    n_t = pl.cdiv(Tout, TF)
    if B * n_t < 2 and Tout >= 32:            # keep both v7x TensorCores busy
        TF = _round_up(pl.cdiv(Tout, 2), 16)
        n_t = pl.cdiv(Tout, TF)

    # ---- wrapper plumbing: ONE pad+cast pass over the 1x-wide source -------
    Tp = n_t * TF + HALO
    x_pad = jnp.pad(x, ((0, 0), (0, Tp - T), (0, 0))).astype(cdt)

    # Shared 64->16 weight replicated across the 4 context slots -> (64, 64).
    wt = jnp.transpose(w)                                         # (64, 16)
    w4 = jnp.concatenate([wt, wt, wt, wt], axis=1).astype(cdt)    # (64, 64)
    b64 = jnp.tile(b.astype(jnp.float32), 4).reshape(1, 64)       # (1, 64)

    # ---- kernel A: per-frame matmul + in-VMEM context + ReLU + BN partials --
    def kernel_a(x_ref, xh_ref, w_ref, b_ref, y_ref, st_ref):
        i = pl.program_id(1)
        xa = jnp.concatenate([x_ref[0], xh_ref[0]], axis=0)       # (TF+HALO, 64)
        z = jnp.dot(xa, w_ref[...], preferred_element_type=jnp.float32)
        z1 = z[0:TF]            # lin(x[t])   -> lanes  0:16 and 48:64
        z2 = z[1:TF + 1]        # lin(x[t+1]) -> lanes 16:32
        z3 = z[2:TF + 2]        # lin(x[t+2]) -> lanes 32:48
        lane = lax.broadcasted_iota(jnp.int32, (TF, 64), 1)
        ctx = jnp.where(lane < 16, z1,
              jnp.where(lane < 32, z2,
              jnp.where(lane < 48, z3, z1)))
        y = jnp.maximum(ctx + b_ref[...], 0.0)                    # (TF, 64) f32
        y_ref[...] = y.astype(y_ref.dtype)[None]

        # BN partial sums; only the last time tile can contain padded frames,
        # so only there do we pay for the row mask.
        @pl.when(i < n_t - 1)
        def _():
            st_ref[...] = jnp.concatenate(
                [jnp.sum(y, axis=0, keepdims=True),
                 jnp.sum(y * y, axis=0, keepdims=True)], axis=0)[None]

        @pl.when(i == n_t - 1)
        def _():
            rows = lax.broadcasted_iota(jnp.int32, (TF, 64), 0)
            ym = jnp.where(i * TF + rows < Tout, y, 0.0)
            st_ref[...] = jnp.concatenate(
                [jnp.sum(ym, axis=0, keepdims=True),
                 jnp.sum(ym * ym, axis=0, keepdims=True)], axis=0)[None]

    y_pre, stats = pl.pallas_call(
        kernel_a,
        out_shape=(
            jax.ShapeDtypeStruct((B, Tout, 64), cdt),
            jax.ShapeDtypeStruct((B * n_t, 2, 64), jnp.float32),
        ),
        grid=(B, n_t),
        in_specs=[
            pl.BlockSpec((1, TF, 64), lambda bb, ii: (bb, ii, 0)),
            pl.BlockSpec((1, HALO, 64),
                         lambda bb, ii: (bb, (ii + 1) * (TF // HALO), 0)),
            pl.BlockSpec((64, 64), lambda bb, ii: (0, 0)),
            pl.BlockSpec((1, 64), lambda bb, ii: (0, 0)),
        ],
        out_specs=(
            pl.BlockSpec((1, TF, 64), lambda bb, ii: (bb, ii, 0)),
            pl.BlockSpec((1, 2, 64), lambda bb, ii: (bb * n_t + ii, 0, 0)),
        ),
        compiler_params=pltpu.CompilerParams(
            dimension_semantics=("parallel", "parallel"),
            vmem_limit_bytes=VMEM_LIMIT,
        ),
    )(x_pad, x_pad, w4, b64)

    # ---- tiny 64-channel stat fold + affine precompute (wrapper, f32) ------
    s = jnp.sum(stats[:, 0, :], axis=0)
    q = jnp.sum(stats[:, 1, :], axis=0)
    mean = s / R
    var = jnp.maximum(q / R - mean * mean, 0.0)       # biased (training) variance
    scale = (gamma.astype(jnp.float32) * lax.rsqrt(var + EPS)).reshape(1, 64)
    shift = beta.astype(jnp.float32).reshape(1, 64) - mean.reshape(1, 64) * scale

    # ---- kernel B: y * scale + shift (large parallel row tiles) -------------
    yb = y_pre.reshape(R, 64)                          # merge leading dims: free
    RB = _round_up(max(16, min(bn_tile_rows, _round_up(R, 16))), 16)
    n_b = pl.cdiv(R, RB)
    if n_b < 2 and R >= 32:                            # keep both v7x TCs busy
        RB = _round_up(pl.cdiv(R, 2), 16)
        n_b = pl.cdiv(R, RB)

    def kernel_b(y_ref, sc_ref, sh_ref, o_ref):
        o_ref[...] = (y_ref[...].astype(jnp.float32) * sc_ref[...]
                      + sh_ref[...]).astype(o_ref.dtype)

    out = pl.pallas_call(
        kernel_b,
        out_shape=jax.ShapeDtypeStruct((R, 64), dt),
        grid=(n_b,),
        in_specs=[
            pl.BlockSpec((RB, 64), lambda ii: (ii, 0)),
            pl.BlockSpec((1, 64), lambda ii: (0, 0)),
            pl.BlockSpec((1, 64), lambda ii: (0, 0)),
        ],
        out_specs=pl.BlockSpec((RB, 64), lambda ii: (ii, 0)),
        compiler_params=pltpu.CompilerParams(
            dimension_semantics=("parallel",),
            vmem_limit_bytes=VMEM_LIMIT,
        ),
    )(yb, scale, shift)

    return out.reshape(B, Tout, 64)


def tdnn_layer2_ref(x, w, b, gamma, beta):
    """Pure-JAX reference mirroring the PyTorch forward (context=[-1,0,1])."""
    Tout = x.shape[1] - 2
    lin = lambda v: v @ w.T + b
    xc0, xc1, xc2 = x[:, 0:Tout], x[:, 1:Tout + 1], x[:, 2:Tout + 2]
    y = jnp.concatenate([lin(xc0), lin(xc1), lin(xc2), lin(xc0)], axis=2)
    y = jnp.maximum(y, 0.0)
    mean = jnp.mean(y, axis=(0, 1), keepdims=True)
    var = jnp.mean((y - mean) ** 2, axis=(0, 1), keepdims=True)
    return (y - mean) / jnp.sqrt(var + EPS) * gamma + beta


if __name__ == "__main__":
    key = jax.random.PRNGKey(0)
    kx, kw, kb, kg, kbt, kx2 = jax.random.split(key, 6)

    # Deterministic parameters (shapes from nn.Linear(64, 16) / BatchNorm1d(64)).
    bound = 1.0 / (64.0 ** 0.5)
    w = jax.random.uniform(kw, (16, 64), jnp.float32, -bound, bound)
    b = jax.random.uniform(kb, (16,), jnp.float32, -bound, bound)
    gamma = 1.0 + 0.1 * jax.random.normal(kg, (64,), jnp.float32)
    beta = 0.1 * jax.random.normal(kbt, (64,), jnp.float32)

    # Case 1: even output-frame count.
    B, T, F = 2, 18, 64                 # Tout = 16
    x = jax.random.normal(kx, (B, T, F), jnp.float32)
    out = tdnn_layer2(x, w, b, gamma, beta)
    jax.block_until_ready(out)
    ref = tdnn_layer2_ref(x, w, b, gamma, beta)
    assert out.shape == (B, T - 2, 64)
    # bf16 staging of x / weight / y_pre -> expected abs error ~1e-2 after BN.
    assert jnp.allclose(out, ref, atol=3e-2, rtol=3e-2), (
        "mismatch (even case): max abs err %e"
        % float(jnp.max(jnp.abs(out - ref))))

    # Case 2: odd output-frame count (partial edge blocks + stats masking).
    B2, T2 = 3, 13                      # Tout = 11, B*Tout = 33 (odd)
    x2 = jax.random.normal(kx2, (B2, T2, F), jnp.float32)
    out2 = tdnn_layer2(x2, w, b, gamma, beta)
    jax.block_until_ready(out2)
    ref2 = tdnn_layer2_ref(x2, w, b, gamma, beta)
    assert out2.shape == (B2, T2 - 2, 64)
    assert jnp.allclose(out2, ref2, atol=3e-2, rtol=3e-2), (
        "mismatch (odd case): max abs err %e"
        % float(jnp.max(jnp.abs(out2 - ref2))))

    print("KERNEL_OK")
</pallas_src>

<mosaic_0001>
module attributes {stable_mosaic.version = 11 : i64} {
  func.func @kernel_a(%arg0: i32, %arg1: i32, %arg2: memref<1x16x64xbf16, #tpu.memory_space<vmem>>, %arg3: memref<1x16x64xbf16, #tpu.memory_space<vmem>>, %arg4: memref<64x64xbf16, #tpu.memory_space<vmem>>, %arg5: memref<1x64xf32, #tpu.memory_space<vmem>>, %arg6: memref<1x16x64xbf16, #tpu.memory_space<vmem>>, %arg7: memref<1x2x64xf32, #tpu.memory_space<vmem>>) attributes {dimension_semantics = [#tpu.dimension_semantics<parallel>, #tpu.dimension_semantics<parallel>], iteration_bounds = array<i64: 2, 1>, scalar_prefetch = 0 : i64, scratch_operands = 0 : i64, tpu.core_type = #tpu.core_type<tc>, window_params = [{transform_indices = @transform_0, window_bounds = array<i64: 1, 16, 64>}, {transform_indices = @transform_1, window_bounds = array<i64: 1, 16, 64>}, {pipeline_mode = #tpu.pipeline_mode<synchronous>, transform_indices = @transform_2, window_bounds = array<i64: 64, 64>}, {pipeline_mode = #tpu.pipeline_mode<synchronous>, transform_indices = @transform_3, window_bounds = array<i64: 1, 64>}, {transform_indices = @transform_4, window_bounds = array<i64: 1, 16, 64>}, {transform_indices = @transform_5, window_bounds = array<i64: 1, 2, 64>}]} {
    %c0 = arith.constant 0 : index
    %c0_0 = arith.constant 0 : index
    %c0_1 = arith.constant 0 : index
    %0 = vector.load %arg2[%c0, %c0_0, %c0_1] : memref<1x16x64xbf16, #tpu.memory_space<vmem>>, vector<1x16x64xbf16>
    %1 = vector.shape_cast %0 : vector<1x16x64xbf16> to vector<16x64xbf16>
    %c0_2 = arith.constant 0 : index
    %c0_3 = arith.constant 0 : index
    %c0_4 = arith.constant 0 : index
    %2 = vector.load %arg3[%c0_2, %c0_3, %c0_4] : memref<1x16x64xbf16, #tpu.memory_space<vmem>>, vector<1x16x64xbf16>
    %3 = vector.shape_cast %2 : vector<1x16x64xbf16> to vector<16x64xbf16>
    %4 = tpu.concatenate %1, %3 in 0 : vector<16x64xbf16>, vector<16x64xbf16> -> vector<32x64xbf16>
    %c0_5 = arith.constant 0 : index
    %c0_6 = arith.constant 0 : index
    %5 = vector.load %arg4[%c0_5, %c0_6] : memref<64x64xbf16, #tpu.memory_space<vmem>>, vector<64x64xbf16>
    %cst = arith.constant dense<0.000000e+00> : vector<32x64xf32>
    %6 = tpu.matmul %4, %5, %cst {dimension_numbers = #tpu.dot_dimension_numbers<[1], [0], [0], [1], [0, 0, 1, 1], [], []>} : vector<32x64xbf16>, vector<64x64xbf16>, vector<32x64xf32> -> vector<32x64xf32>
    %7 = vector.extract_strided_slice %6 {offsets = [0, 0], sizes = [16, 64], strides = [1, 1]} : vector<32x64xf32> to vector<16x64xf32>
    %8 = vector.extract_strided_slice %6 {offsets = [1, 0], sizes = [16, 64], strides = [1, 1]} : vector<32x64xf32> to vector<16x64xf32>
    %9 = vector.extract_strided_slice %6 {offsets = [2, 0], sizes = [16, 64], strides = [1, 1]} : vector<32x64xf32> to vector<16x64xf32>
    %10 = tpu.iota {dimensions = array<i32: 1>} : vector<16x64xi32>
    %c16_i32 = arith.constant 16 : i32
    %11 = vector.broadcast %c16_i32 : i32 to vector<16x64xi32>
    %12 = arith.cmpi slt, %10, %11 : vector<16x64xi32>
    %c32_i32 = arith.constant 32 : i32
    %13 = vector.broadcast %c32_i32 : i32 to vector<16x64xi32>
    %14 = arith.cmpi slt, %10, %13 : vector<16x64xi32>
    %c48_i32 = arith.constant 48 : i32
    %15 = vector.broadcast %c48_i32 : i32 to vector<16x64xi32>
    %16 = arith.cmpi slt, %10, %15 : vector<16x64xi32>
    %17 = arith.select %16, %9, %7 : vector<16x64xi1>, vector<16x64xf32>
    %18 = arith.select %14, %8, %17 : vector<16x64xi1>, vector<16x64xf32>
    %19 = arith.select %12, %7, %18 : vector<16x64xi1>, vector<16x64xf32>
    %c0_7 = arith.constant 0 : index
    %c0_8 = arith.constant 0 : index
    %20 = vector.load %arg5[%c0_7, %c0_8] : memref<1x64xf32, #tpu.memory_space<vmem>>, vector<1x64xf32>
    %21 = vector.broadcast %20 : vector<1x64xf32> to vector<16x64xf32>
    %22 = arith.addf %19, %21 : vector<16x64xf32>
    %cst_9 = arith.constant 0.000000e+00 : f32
    %23 = vector.broadcast %cst_9 : f32 to vector<16x64xf32>
    %24 = arith.maximumf %22, %23 : vector<16x64xf32>
    %25 = arith.truncf %24 : vector<16x64xf32> to vector<16x64xbf16>
    %26 = vector.shape_cast %25 : vector<16x64xbf16> to vector<1x16x64xbf16>
    %c0_10 = arith.constant 0 : index
    %c0_11 = arith.constant 0 : index
    %c0_12 = arith.constant 0 : index
    %27 = vector.load %arg6[%c0_10, %c0_11, %c0_12] : memref<1x16x64xbf16, #tpu.memory_space<vmem>>, vector<1x16x64xbf16>
    tpu.vector_store %arg6[%c0_10, %c0_11, %c0_12], %26 {strides = array<i32>} : memref<1x16x64xbf16, #tpu.memory_space<vmem>>, vector<1x16x64xbf16>,
    %c0_i32 = arith.constant 0 : i32
    %28 = arith.cmpi slt, %arg1, %c0_i32 : i32
    %29 = arith.extui %28 : i1 to i32
    %c0_i32_13 = arith.constant 0 : i32
    %30 = arith.cmpi ne, %29, %c0_i32_13 : i32
    scf.if %30 {
      %cst_16 = arith.constant dense<0.000000e+00> : vector<64xf32>
      %34 = vector.multi_reduction <add>, %24, %cst_16 [0] : vector<16x64xf32> to vector<64xf32>
      %35 = vector.shape_cast %34 : vector<64xf32> to vector<1x64xf32>
      %36 = arith.mulf %24, %24 : vector<16x64xf32>
      %cst_17 = arith.constant dense<0.000000e+00> : vector<64xf32>
      %37 = vector.multi_reduction <add>, %36, %cst_17 [0] : vector<16x64xf32> to vector<64xf32>
      %38 = vector.shape_cast %37 : vector<64xf32> to vector<1x64xf32>
      %39 = tpu.concatenate %35, %38 in 0 : vector<1x64xf32>, vector<1x64xf32> -> vector<2x64xf32>
      %40 = vector.shape_cast %39 : vector<2x64xf32> to vector<1x2x64xf32>
      %c0_18 = arith.constant 0 : index
      %c0_19 = arith.constant 0 : index
      %c0_20 = arith.constant 0 : index
      %41 = vector.load %arg7[%c0_18, %c0_19, %c0_20] : memref<1x2x64xf32, #tpu.memory_space<vmem>>, vector<1x2x64xf32>
      tpu.vector_store %arg7[%c0_18, %c0_19, %c0_20], %40 {strides = array<i32>} : memref<1x2x64xf32, #tpu.memory_space<vmem>>, vector<1x2x64xf32>,
    } else {
    }
    %c0_i32_14 = arith.constant 0 : i32
    %31 = arith.cmpi eq, %arg1, %c0_i32_14 : i32
    %32 = arith.extui %31 : i1 to i32
    %c0_i32_15 = arith.constant 0 : i32
    %33 = arith.cmpi ne, %32, %c0_i32_15 : i32
    scf.if %33 {
      %34 = tpu.iota {dimensions = array<i32: 0>} : vector<16x64xi32>
      %c16_i32_16 = arith.constant 16 : i32
      %35 = arith.muli %arg1, %c16_i32_16 : i32
      %36 = vector.broadcast %35 : i32 to vector<16x64xi32>
      %37 = arith.addi %36, %34 : vector<16x64xi32>
      %c16_i32_17 = arith.constant 16 : i32
      %38 = vector.broadcast %c16_i32_17 : i32 to vector<16x64xi32>
      %39 = arith.cmpi slt, %37, %38 : vector<16x64xi32>
      %cst_18 = arith.constant 0.000000e+00 : f32
      %40 = vector.broadcast %cst_18 : f32 to vector<16x64xf32>
      %41 = arith.select %39, %24, %40 : vector<16x64xi1>, vector<16x64xf32>
      %cst_19 = arith.constant dense<0.000000e+00> : vector<64xf32>
      %42 = vector.multi_reduction <add>, %41, %cst_19 [0] : vector<16x64xf32> to vector<64xf32>
      %43 = vector.shape_cast %42 : vector<64xf32> to vector<1x64xf32>
      %44 = arith.mulf %41, %41 : vector<16x64xf32>
      %cst_20 = arith.constant dense<0.000000e+00> : vector<64xf32>
      %45 = vector.multi_reduction <add>, %44, %cst_20 [0] : vector<16x64xf32> to vector<64xf32>
      %46 = vector.shape_cast %45 : vector<64xf32> to vector<1x64xf32>
      %47 = tpu.concatenate %43, %46 in 0 : vector<1x64xf32>, vector<1x64xf32> -> vector<2x64xf32>
      %48 = vector.shape_cast %47 : vector<2x64xf32> to vector<1x2x64xf32>
      %c0_21 = arith.constant 0 : index
      %c0_22 = arith.constant 0 : index
      %c0_23 = arith.constant 0 : index
      %49 = vector.load %arg7[%c0_21, %c0_22, %c0_23] : memref<1x2x64xf32, #tpu.memory_space<vmem>>, vector<1x2x64xf32>
      tpu.vector_store %arg7[%c0_21, %c0_22, %c0_23], %48 {strides = array<i32>} : memref<1x2x64xf32, #tpu.memory_space<vmem>>, vector<1x2x64xf32>,
    } else {
    }
    return
  }
  func.func @transform_0(%arg0: i32, %arg1: i32) -> (i32, i32, i32) {
    %c0_i32 = arith.constant 0 : i32
    %c0_i32_0 = arith.constant 0 : i32
    return %arg0, %arg1, %c0_i32 : i32, i32, i32
  }
  func.func @transform_1(%arg0: i32, %arg1: i32) -> (i32, i32, i32) {
    %c1_i32 = arith.constant 1 : i32
    %0 = arith.addi %arg1, %c1_i32 : i32
    %c1_i32_0 = arith.constant 1 : i32
    %1 = arith.muli %0, %c1_i32_0 : i32
    %c0_i32 = arith.constant 0 : i32
    %c0_i32_1 = arith.constant 0 : i32
    return %arg0, %1, %c0_i32 : i32, i32, i32
  }
  func.func @transform_2(%arg0: i32, %arg1: i32) -> (i32, i32) {
    %c0_i32 = arith.constant 0 : i32
    %c0_i32_0 = arith.constant 0 : i32
    %c0_i32_1 = arith.constant 0 : i32
    return %c0_i32, %c0_i32_0 : i32, i32
  }
  func.func @transform_3(%arg0: i32, %arg1: i32) -> (i32, i32) {
    %c0_i32 = arith.constant 0 : i32
    %c0_i32_0 = arith.constant 0 : i32
    %c0_i32_1 = arith.constant 0 : i32
    return %c0_i32, %c0_i32_0 : i32, i32
  }
  func.func @transform_4(%arg0: i32, %arg1: i32) -> (i32, i32, i32) {
    %c0_i32 = arith.constant 0 : i32
    %c0_i32_0 = arith.constant 0 : i32
    return %arg0, %arg1, %c0_i32 : i32, i32, i32
  }
  func.func @transform_5(%arg0: i32, %arg1: i32) -> (i32, i32, i32) {
    %c1_i32 = arith.constant 1 : i32
    %0 = arith.muli %arg0, %c1_i32 : i32
    %1 = arith.addi %0, %arg1 : i32
    %c0_i32 = arith.constant 0 : i32
    %c0_i32_0 = arith.constant 0 : i32
    %c0_i32_1 = arith.constant 0 : i32
    return %1, %c0_i32, %c0_i32_0 : i32, i32, i32
  }
}

</mosaic_0001>

<bundles_post_ra>
// kernel: tpu_custom_call.1
= control target key start
LH: loop header
LB: loop body
LE: loop exit
PB: predicated region body
PF: predicated region fallthrough
CT: control target
= control target key end

     0   :  { %s1409_s0 = inlined_call_operand.hbm [shape: bf16[2,32,64], index: 0, kind: input, shape index: {}]   ;;  %s1410_s1 = inlined_call_operand.hbm [shape: bf16[2,32,64], index: 1, kind: input, shape index: {}]   ;;  %s1411_s2 = inlined_call_operand.hbm [shape: bf16[64,64], index: 2, kind: input, shape index: {}]   ;;  %s1412_s3 = inlined_call_operand.vmem [shape: f32[1,64], index: 3, kind: input, shape index: {}]   ;;  %s1413_s4 = inlined_call_operand.hbm [shape: bf16[2,16,64], index: 4, kind: output, shape index: {0}]   ;;  %s1414_s5 = inlined_call_operand.hbm [shape: f32[2,2,64], index: 5, kind: output, shape index: {1}]  }
   0x1   :  { %1421 = sst [smem:[#allocation18_spill]] %s1409_s0 }
   0x2   :  { %1422 = sst [smem:[#allocation19_spill]] %s1411_s2 }
   0x3   :  { %11 = vsyncpa [#allocation3], 0 }
   0x4   :  { %13 = vsyncpa [#allocation3 + $0x1], 0 }
   0x5   :  { %14 = vsyncpa [#allocation6], 0 }
   0x6   :  { %16 = vsyncpa [#allocation6 + $0x1], 0 }
   0x7   :  { %17 = vsyncpa [#allocation4], 0 }
   0x8   :  { %19 = vsyncpa [#allocation4 + $0x1], 0 }
   0x9   :  { %20 = vsyncpa [#allocation10], 0 }
   0xa   :  { %22 = vsyncpa [#allocation10 + $0x1], 0  ;;  %s1159_s18 = smov 0   ;;  %s1161_s19 = smov 0  }
   0xb   :  { %s1163_s20 = smov 0   ;;  %s1165_s21 = smov 0  }
   0xc   :  { %s1167_s22 = smov 0   ;;  %s1169_s23 = smov 0  }
   0xd LB: > { %1423 = sst [smem:[#allocation16_spill]] %s1114_s22  ;;  %s1190_s24 = sadd.s32 4294967295, %s1118_s23   ;;  %s1118_s23 = sphi %s1169_s23, %s28_s23   ;;  %s1114_s22 = sphi %s1167_s22, %s1440_s22   ;;  %s1110_s21 = sphi %s1165_s21, %s1439_s21   ;;  %s1106_s20 = sphi %s1163_s20, %s1443_s20   ;;  %s1102_s19 = sphi %s1161_s19, %s1442_s19   ;;  %s1098_s18 = sphi %s1159_s18, %s1441_s18  }
   0xe   : > { %s767_s25 = sadd.s32 4294967294, %s1118_s23   ;;  %p62_p0 = scmp.ne.s32.totalorder %s1102_s19, %s1098_s18 }
   0xf   : > { %p63_p1 = scmp.eq.s32.totalorder %s1190_s24, 0  ;;  %p166_p3 = scmp.eq.s32.totalorder %s767_s25, 1 }
  0x10   : > { %p768_p5 = scmp.ge.s32.totalorder %s1118_s23, 1  ;;  %p201_p7 = scmp.lt.s32.totalorder %s1118_s23, 3 }
  0x11   : > { %p1199_p4 = por %p63_p1, %p62_p0  ;;  %p1204_p6 = por %p166_p3, %p62_p0 }
  0x12   : > { %p1209_p8 = pnand %p768_p5, %p201_p7  ;;  %s1120_s29 = smov [#allocation7]  }
  0x13   : > { %s1425_s27 = scalar_select %p1204_p6, 1, 0 }
  0x14   : > { %s213_s30 = sshll.u32 %s1120_s29, 4  ;;  %p836_p9 = pneg %p1209_p8  ;;  %s214_s30 = int_to_ptr.vmem [resolvable:$true] %s213_s30 }
  0x15   : > { %p770_p10 = scmp.ge.s32.totalorder %s1118_s23, 2  ;;  %s40_s7 = sadd.s32 1, %s1114_s22 }
  0x16   : > { %p1218_p11 = pnand %p836_p9, %p63_p1  ;;  %s928_s8 = scalar_lea.vmem %s214_s30, 512 }
  0x17   : > { %p929_p13 = scmp.ne.s32.totalorder %s214_s30, %s928_s8  ;;  %p936_p5 = scmp.lt.s32.totalorder %s214_s30, %s214_s30 }
  0x18   : > { %p919_p12 = pneg %p1218_p11  ;;  %p937_p7 = scmp.lt.s32.totalorder %s928_s8, %s928_s8 }
  0x1a   : > { %p931_p0 = pnand %p929_p13, %p919_p12  ;;  %p938_p2 = por %p937_p7, %p936_p5 }
  0x1c   : > { %p932_p3 = pneg %p931_p0 }
  0x1e   : > { %p939_p6 = pnand %p938_p2, %p932_p3 }
  0x20   : > { %942 = shalt.err (!%p939_p6)
}
  0x21   : > { %s1415_s9 = smov 64   ;;  %s1417_s10 = smov 4  }
  0x22   : > { %s1428_s2 = sld [smem:[#allocation19_spill]]  ;;  %p42_p2 = scmp.ge.s32.totalorder %s40_s7, 2 }
  0x23   : > { %s49_s13 = sadd.s32 1, %s1106_s20  ;;  %p56_p6 = scmp.ne.s32.totalorder %s1106_s20, %s1102_s19 }
  0x24   : > { %p57_p9 = scmp.eq.s32.totalorder %s1118_s23, 0  ;;  %s1445_s7 = smov (%p42_p2, %s40_s7), 0 }
  0x25   : > { %1429 = sst [smem:[#allocation17_spill]] %s1445_s7  ;;  %p1431_p13 = scmp.eq.s32.totalorder %s1190_s24, 1 }
  0x26   : > { %p1239_p12 = por %p57_p9, %p56_p6  ;;  %s44_s16 = ssub.s32 %s1114_s22, %s1445_s7 }
  0x27   : > { %p1245_p0 = por %p1431_p13, %p56_p6  ;;  %p855_p3 = scmp.lt.s32.totalorder %s1118_s23, 2 }
  0x28   : > { %839 = dma.hbm_to_vmem [thread:$0]  (!%p1218_p11), %s1428_s2, 512, %s214_s30, [#allocation6], %s1415_s9, %s1415_s9, %s1417_s10  }
  0x29   : > { %p47_p11 = scmp.eq.s32.totalorder %s44_s16, 0  ;;  %s230_s17 = sand.u32 1, %s1106_s20  }
  0x2a   : > { %s1253_s25 = sshll.u32 %s230_s17, 3  ;;  %s801_s30 = sshll.u32 %s1114_s22, 8 }
  0x2b   : > { %s1256_s29 = scalar_select %p47_p11, %s1106_s20, %s49_s13  }
  0x2c   : > { %s1433_s0 = sld [smem:[#allocation18_spill]]  ;;  %s234_s12 = scalar_lea.vmem [#allocation2], %s1253_s25 }
  0x2d   : > { %s243_s9 = sshll.u32 %s234_s12, 4  ;;  %p1265_p5 = pnand %p855_p3, %p1239_p12  ;;  %s244_s9 = int_to_ptr.vmem [resolvable:$true] %s243_s9 }
  0x2e   : > { %s1272_s13 = scalar_lea.hbm %s1410_s1, %s801_s30  ;;  %s231_s22 = scalar_lea.sflag [#allocation3], %s230_s17 }
  0x2f   : > { %p945_p7 = pneg %p1265_p5  ;;  %s956_s6 = scalar_lea.vmem %s244_s9, 128 }
  0x30   : > { %p957_p2 = scmp.ne.s32.totalorder %s244_s9, %s956_s6  ;;  %s1123_s14 = smov [#allocation2]  }
  0x31   : > { %s961_s8 = sshll.u32 %s1123_s14, 4  ;;  %s962_s8 = int_to_ptr.vmem [resolvable:$false] %s961_s8 }
  0x32   : > { %s242_s11 = scalar_lea.hbm %s1433_s0, %s801_s30  ;;  %p959_p6 = pnand %p957_p2, %p945_p7 }
  0x33   : > { %s963_s12 = scalar_lea.vmem %s962_s8, 256  ;;  %p964_p12 = scmp.lt.s32.totalorder %s244_s9, %s962_s8 }
  0x34   : > { %p960_p9 = pneg %p959_p6  ;;  %p965_p13 = scmp.lt.s32.totalorder %s963_s12, %s956_s6 }
  0x36   : > { %p966_p3 = por %p965_p13, %p964_p12 }
  0x38   : > { %p967_p11 = pnand %p966_p3, %p960_p9 }
  0x3a   : > { %970 = shalt.err (!%p967_p11)
}
  0x3b   : > { %s1435_s2 = smov 4   ;;  %s1436_s17 = smov 64  }
  0x3c   : > { %843 = dma.hbm_to_vmem [thread:$0]  (!%p1265_p5), %s242_s11, 128, %s244_s9, %s231_s22, %s1436_s17, %s1436_s17, %s1435_s2  }
  0x3d   : > { %s257_s30 = scalar_lea.vmem [#allocation5], %s1253_s25  ;;  %s253_s7 = sand.u32 1, %s1118_s23  }
  0x3e   : > { %s267_s16 = sshll.u32 %s257_s30, 4  ;;  %s254_s14 = scalar_lea.sflag [#allocation6], %s253_s7  ;;  %s268_s16 = int_to_ptr.vmem [resolvable:$true] %s267_s16 }
  0x3f   : > { %s984_s0 = scalar_lea.vmem %s268_s16, 128  ;;  %s1124_s6 = smov [#allocation5]  }
  0x40   : > { %p985_p2 = scmp.ne.s32.totalorder %s268_s16, %s984_s0  ;;  %s989_s8 = sshll.u32 %s1124_s6, 4  ;;  %s990_s8 = int_to_ptr.vmem [resolvable:$false] %s989_s8 }
  0x41   : > { %s991_s12 = scalar_lea.vmem %s990_s8, 256  ;;  %p992_p12 = scmp.lt.s32.totalorder %s268_s16, %s990_s8 }
  0x42   : > { %p987_p6 = pnand %p985_p2, %p945_p7  ;;  %p993_p13 = scmp.lt.s32.totalorder %s991_s12, %s984_s0 }
  0x44   : > { %p988_p9 = pneg %p987_p6  ;;  %p994_p3 = por %p993_p13, %p992_p12 }
  0x46   : > { %p995_p11 = pnand %p994_p3, %p988_p9 }
  0x48   : > { %998 = shalt.err (!%p995_p11)
}
  0x49   : > { %s1437_s22 = scalar_lea.hbm %s1272_s13, 128  ;;  %279 = sbr.rel (%p1209_p8) target bundleno = 359 (0x167), region = 36 }
  0x4a   : > { %846 = dma.hbm_to_vmem [thread:$0]  (!%p1265_p5), %s1437_s22, 128, %s268_s16, %s254_s14, %s1436_s17, %s1436_s17, %s1435_s2  }
  0x4b   : > { %s1300_s7 = sand.u32 (!%p1209_p8), 1, %s1102_s19  }
  0x4c   : > { %s1303_s0 = sshll.u32 (!%p1209_p8), %s1300_s7, 3  ;;  %s282_s9 = scalar_lea.sflag (!%p1209_p8), [#allocation3], %s1300_s7 }
  0x4d   : > { %s285_s10 = scalar_lea.vmem (!%p1209_p8), [#allocation2], %s1303_s0 }
  0x4e   : > { %1077 = dma.done.wait (%p1199_p4), %s282_s9, 128  }
  0x4f   : > { %1079 = vsyncadd (%p1199_p4), %s282_s9, 4294967168  ;;  %s290_s28 = sand.u32 1, %s1190_s24   ;;  %s294_s11 = scalar_lea.vmem [#allocation5], %s1303_s0 }
  0x50   : > { %s291_s25 = scalar_lea.sflag [#allocation6], %s290_s28 }
  0x51   : > { %1081 = dma.done.wait (%p1199_p4), %s291_s25, 128  }
  0x52   : > { %1083 = vsyncadd (%p1199_p4), %s291_s25, 4294967168 }
  0x53   : > { %1085 = dma.done.wait (%p63_p1), [#allocation6], 512  }
  0x54   : > { %1087 = vsyncadd (%p63_p1), [#allocation6], 4294966784  ;;  %v911_v0 = vld [vmem:[#allocation7 + $0x18] sm:$0xff]   ;;  %v912_v1 = vld [vmem:[#allocation7 + $0x10] sm:$0xff]   ;;  %vm387_vm0 = vcmask 523264   ;;  %v442_v6 = vlaneseq  ;;  %vm449_vm2 = vcmask 1041408  }
  0x55   : > { %812 = vmatprep.subr.bf16.mxu0 %v911_v0  ;;  %v913_v2 = vld [vmem:[#allocation7 + $0x8] sm:$0xff]   ;;  %v914_v4 = vld [vmem:[#allocation7] sm:$0xff]   ;;  %v916_v5 = vld [vmem:[%s294_s11] sm:$0xff]   ;;  %vm462_vm4 = vcmask 1046528   ;;  %s805_s13 = sshll.u32 %s1110_s21, 7  ;;  %s327_s2 = scalar_lea.vmem [#allocation8], %s1303_s0 }
  0x56   : > { %813 = vmatpush3.bf16.msra.mxu0 %v911_v0  ;;  %v915_v3 = vld [vmem:[%s285_s10] sm:$0xff]   ;;  %v443_v8 = vand.u32 127, %v442_v6  ;;  %s596_s17 = sshll.u32 %s327_s2, 4  ;;  %vm505_vm6 = vcmask 519168   ;;  %s1331_s14 = scalar_lea.hbm %s1413_s4, %s805_s13  ;;  %s1333_s17 = int_to_ptr.vmem [resolvable:$true] %s596_s17 }
  0x57   : > { %814 = vmatprep.subr.bf16.mxu0 %v912_v1  ;;  %820 = vmatprep.mubr.msk.bf16.mxu0 %vm387_vm0, %v915_v3  ;;  %v791_v29 = vld [vmem:[%s1412_s3] ss:$0 sm:$0xff]  ;;  %s576_s6 = scalar_lea.sflag [#allocation4], %s1300_s7  ;;  %s1000_s8 = scalar_lea.vmem %s1333_s17, 128 }
  0x58   : > { %vm446_vm1 = vcmp.lt.s32.totalorder %v443_v8, 48  ;;  %vm445_vm3 = vcmp.lt.s32.totalorder %v443_v8, 32  ;;  %vm444_vm5 = vcmp.lt.s32.totalorder %v443_v8, 16  ;;  %p1001_p1 = scmp.ne.s32.totalorder %s1333_s17, %s1000_s8  ;;  %s1125_s12 = smov [#allocation8]  }
  0x59   : > { %s1004_s22 = sshll.u32 %s1125_s12, 4  ;;  %s1005_s22 = int_to_ptr.vmem [resolvable:$false] %s1004_s22 }
  0x5a   : > { %815 = vmatpush3.bf16.msra.mxu0 %v912_v1  ;;  %p1002_p4 = pnand %p1001_p1, %p1245_p0  ;;  %s1006_s0 = scalar_lea.vmem %s1005_s22, 256 }
  0x5b   : > { %816 = vmatprep.subr.bf16.mxu0 %v913_v2  ;;  %p1007_p5 = scmp.lt.s32.totalorder %s1333_s17, %s1005_s22  ;;  %p1008_p7 = scmp.lt.s32.totalorder %s1006_s0, %s1000_s8 }
  0x5c   : > { %p1003_p8 = pneg %p1002_p4 }
  0x5d   : > { %p1009_p2 = por %p1008_p7, %p1007_p5 }
  0x5e   : > { %817 = vmatpush3.bf16.msra.mxu0 %v913_v2 }
  0x5f   : > { %818 = vmatprep.subr.bf16.mxu0 %v914_v4  ;;  %p1010_p6 = pnand %p1009_p2, %p1003_p8 }
  0x62   : > { %819 = vmatpush3.bf16.msra.mxu0 %v914_v4 }
  0x65   : > { %821 = vmatmul.mubr.msk.bf16.vlgmr.msra.gmra.mxu0 %vm387_vm0, %v916_v5 }
 0x125   : > { %v822_v7 = vpop.f32.mrf.mxu0 }
 0x127   : > { %v428_v9 = vpop.f32.mrf.mxu0 }
 0x128   : > { %v450_v10 = vrot.slane %v428_v9, 6 }
 0x129   : > { %v823_v11 = vpop.f32.mrf.mxu0 }
 0x12a   : > { %v456_v14 = vsel %vm446_vm1, %v428_v9, %v450_v10 }
 0x12b   : > { %v431_v12 = vpop.f32.mrf.mxu0  ;;  %v463_v19 = vrot.slane %v456_v14, 1 }
 0x12c   : > { %v451_v13 = vrot.slane %v431_v12, 6 }
 0x12e   : > { %v452_v15 = vsel %vm449_vm2, %v450_v10, %v451_v13  ;;  %v458_v16 = vsel %vm446_vm1, %v822_v7, %v451_v13 }
 0x12f   : > { %v457_v17 = vsel %vm446_vm1, %v431_v12, %v452_v15  ;;  %v466_v18 = vrot.slane %v458_v16, 1 }
 0x130   : > { %v464_v20 = vrot.slane %v457_v17, 1 }
 0x131   : > { %v473_v21 = vsel %vm445_vm3, %v822_v7, %v466_v18 }
 0x132   : > { %v465_v22 = vsel %vm462_vm4, %v463_v19, %v464_v20  ;;  %v467_v23 = vsel %vm462_vm4, %v464_v20, %v466_v18  ;;  %v480_v28 = vrot.slane %v473_v21, 1 }
 0x133   : > { %v471_v24 = vsel %vm445_vm3, %v428_v9, %v465_v22  ;;  %v472_v25 = vsel %vm445_vm3, %v431_v12, %v467_v23 }
 0x134   : > { %v477_v26 = vrot.slane %v471_v24, 1  ;;  %v478_v27 = vrot.slane %v472_v25, 1 }
 0x136   : > { %v479_v30 = vsel %vm462_vm4, %v477_v26, %v478_v27  ;;  %v481_v31 = vsel %vm462_vm4, %v478_v27, %v480_v28 }
 0x137   : > { %v484_v32 = vsel %vm444_vm5, %v428_v9, %v479_v30  ;;  %v485_v33 = vsel %vm444_vm5, %v431_v12, %v481_v31 }
 0x138   : > { %v493_v34 = vadd.f32 %v791_v29, %v484_v32  ;;  %v494_v35 = vadd.f32 %v791_v29, %v485_v33 }
 0x13a   : > { %v495_v36 = vmax.f32 %v493_v34, 0.0  ;;  %v496_v37 = vmax.f32 %v494_v35, 0.0 }
 0x13c   : > { %v803_v38 = vpack.c.bf16 %v495_v36, %v495_v36  ;;  %v804_v39 = vpack.c.bf16 %v496_v37, %v496_v37  ;;  %v551_v40 = vsel %vm387_vm0, %v495_v36, 0.0  ;;  %v552_v41 = vsel %vm387_vm0, %v496_v37, 0.0 }
 0x13d   : > { %v553_v42 = vadd.f32 %v552_v41, %v551_v40  ;;  %v560_v43 = vmul.f32 %v495_v36, %v495_v36  ;;  %v561_v44 = vmul.f32 %v496_v37, %v496_v37 }
 0x13e   : > { %506 = vst.msk [vmem:[%s327_s2] sm:$0xf] %vm505_vm6, %v803_v38  ;;  %507 = vst.msk [vmem:[%s327_s2 + $0x4] sm:$0xf] %vm505_vm6, %v804_v39 }
 0x13f   : > { %v554_v45 = vrot.slane %v553_v42, 4  ;;  %v562_v46 = vsel %vm387_vm0, %v560_v43, 0.0  ;;  %v563_v47 = vsel %vm387_vm0, %v561_v44, 0.0 }
 0x140   : > { %1013 = shalt.err (!%p1010_p6)
}
 0x141   : > { %s1014_s9 = scalar_lea.hbm %s1331_s14, 128  ;;  %s1018_s25 = scalar_lea.hbm %s1413_s4, 256 }
 0x142   : > { %p1015_p9 = scmp.ne.s32.totalorder %s1331_s14, %s1014_s9  ;;  %p1019_p3 = scmp.lt.s32.totalorder %s1331_s14, %s1413_s4 }
 0x143   : > { %p1020_p11 = scmp.lt.s32.totalorder %s1018_s25, %s1014_s9 }
 0x144   : > { %p1016_p12 = pnand %p1015_p9, %p1245_p0 }
 0x145   : > { %p1021_p1 = por %p1020_p11, %p1019_p3 }
 0x146   : > { %p1017_p13 = pneg %p1016_p12 }
 0x148   : > { %p1022_p4 = pnand %p1021_p1, %p1017_p13 }
 0x14a   : > { %1025 = shalt.err (!%p1022_p4)
}
 0x14b   : > { %s1126_s26 = smov 64   ;;  %s1127_s13 = smov 4   ;;  %v564_v48 = vadd.f32 %v563_v47, %v562_v46  ;;  %v555_v49 = vadd.f32 %v554_v45, %v553_v42  ;;  %vm571_vm7 = vcmask 1040384   ;;  %vm573_vm8 = vcmask 517120  }
 0x14c   : > { %832 = dma.vmem_to_hbm [thread:$0]  (%p1245_p0), %s1333_s17, 128, %s1331_s14, %s576_s6, %s1126_s26, %s1126_s26, %s1127_s13  }
 0x14d   : > { %v565_v50 = vrot.slane %v564_v48, 4  ;;  %v556_v51 = vrot.slane %v555_v49, 2  ;;  %s782_s2 = sshll.u32 %s1300_s7, 1  ;;  %s798_s30 = sshll.u32 %s1110_s21, 5 }
 0x14e   : > { %s334_s16 = scalar_lea.vmem [#allocation9], %s782_s2  ;;  %s1367_s6 = scalar_lea.hbm %s1414_s5, %s798_s30 }
 0x14f   : > { %v566_v52 = vadd.f32 %v565_v50, %v564_v48  ;;  %v557_v53 = vadd.f32 %v556_v51, %v555_v49  ;;  %s613_s8 = sshll.u32 %s334_s16, 4  ;;  %s581_s12 = scalar_lea.sflag [#allocation10], %s1300_s7  ;;  %s614_s8 = int_to_ptr.vmem [resolvable:$true] %s613_s8 }
 0x150   : > { %s1026_s22 = scalar_lea.vmem %s614_s8, 32  ;;  %s1128_s21 = smov [#allocation9]  }
 0x151   : > { %v567_v54 = vrot.slane %v566_v52, 2  ;;  %v558_v55 = vrot.slane %v557_v53, 1  ;;  %p1027_p8 = scmp.ne.s32.totalorder %s614_s8, %s1026_s22  ;;  %s1030_s0 = sshll.u32 %s1128_s21, 4  ;;  %s1031_s0 = int_to_ptr.vmem [resolvable:$false] %s1030_s0 }
 0x152   : > { %s1032_s9 = scalar_lea.vmem %s1031_s0, 64  ;;  %p1033_p2 = scmp.lt.s32.totalorder %s614_s8, %s1031_s0 }
 0x153   : > { %v568_v56 = vadd.f32 %v567_v54, %v566_v52  ;;  %v559_v58 = vadd.f32 %v558_v55, %v557_v53  ;;  %p1028_p5 = pnand %p1027_p8, %p1245_p0  ;;  %p1034_p6 = scmp.lt.s32.totalorder %s1032_s9, %s1026_s22 }
 0x155   : > { %v569_v57 = vrot.slane %v568_v56, 1  ;;  %p1029_p7 = pneg %p1028_p5  ;;  %p1035_p9 = por %p1034_p6, %p1033_p2 }
 0x157   : > { %v570_v59 = vadd.f32 %v569_v57, %v568_v56  ;;  %p1036_p12 = pnand %p1035_p9, %p1029_p7 }
 0x159   : > { %v572_v60 = vsel %vm571_vm7, %v559_v58, %v570_v59 }
 0x15a   : > { %574 = vst.msk [vmem:[%s334_s16] sm:$0x3] %vm573_vm8, %v572_v60 }
 0x15b   : > { %1039 = shalt.err (!%p1036_p12)
}
 0x15c   : > { %s1040_s10 = scalar_lea.hbm %s1367_s6, 32  ;;  %s1044_s25 = scalar_lea.hbm %s1414_s5, 64 }
 0x15d   : > { %p1041_p13 = scmp.ne.s32.totalorder %s1367_s6, %s1040_s10  ;;  %p1045_p1 = scmp.lt.s32.totalorder %s1367_s6, %s1414_s5 }
 0x15e   : > { %p1046_p4 = scmp.lt.s32.totalorder %s1044_s25, %s1040_s10 }
 0x15f   : > { %p1042_p3 = pnand %p1041_p13, %p1245_p0 }
 0x160   : > { %p1047_p8 = por %p1046_p4, %p1045_p1 }
 0x161   : > { %p1043_p11 = pneg %p1042_p3 }
 0x163   : > { %p1048_p5 = pnand %p1047_p8, %p1043_p11 }
 0x165   : > { %1051 = shalt.err (!%p1048_p5)
}
 0x166   : > { %833 = dma.vmem_to_hbm [thread:$0]  (%p1245_p0), %s614_s8, 32, %s1367_s6, %s581_s12  }
 0x167 PF: > { %s625_s26 = sand.u32 1, %s1098_s18   ;;  %p1438_p7 = scmp.ne.s32.totalorder %s1425_s27, 0 }
 0x168   : > { %s626_s13 = scalar_lea.sflag [#allocation4], %s625_s26 }
 0x169   : > { %p848_p2 = pnand %p770_p10, %p1438_p7 }
 0x16b   : > { %p849_p6 = pneg %p848_p2 }
 0x16d   : > { %1089 = dma.done.wait (%p849_p6), %s626_s13, 128  }
 0x16e   : > { %1091 = vsyncadd (%p849_p6), %s626_s13, 4294967168  ;;  %s635_s2 = scalar_lea.sflag [#allocation10], %s625_s26 }
 0x16f   : > { %1093 = dma.done.wait (%p849_p6), %s635_s2, 32  }
 0x170   : > { %1095 = vsyncadd (%p849_p6), %s635_s2, 4294967264  ;;  %s28_s23 = sadd.s32 1, %s1118_s23   ;;  %s1439_s21 = sld [smem:[#allocation16_spill]] }
 0x171   : > { %p25_p9 = scmp.ge.s32.totalorder %s28_s23, 4   ;;  %s1440_s22 = sld [smem:[#allocation17_spill]] }
 0x172   : > { %s1441_s18 = smov %s1102_s19  ;;  %s1442_s19 = smov %s1106_s20 }
 0x173   : > { %s1443_s20 = smov %s1256_s29  ;;  %27 = sbr.rel (!%p25_p9) target bundleno = 13 (0xd), region = 123 }
 0x178   :  { %640 = vsyncpa [#allocation3], 1 }
 0x179   :  { %642 = vsyncpa [#allocation3 + $0x1], 1 }
 0x17a   :  { %643 = vsyncpa [#allocation6], 1 }
 0x17b   :  { %645 = vsyncpa [#allocation6 + $0x1], 1 }
 0x17c   :  { %646 = vsyncpa [#allocation4], 1 }
 0x17d   :  { %648 = vsyncpa [#allocation4 + $0x1], 1 }
 0x17e   :  { %649 = vsyncpa [#allocation10], 1 }
 0x17f   :  { %651 = vsyncpa [#allocation10 + $0x1], 1 }

</bundles_post_ra>
